<compile_context>
chip_gen: v5e
topology: v5e:2x2
jax: 0.10.0
libtpu: 0.0.40
codegen_flags: <defaults>
</compile_context>

<pallas_src>
import jax
import jax.numpy as jnp
import numpy as np
from jax.experimental import pallas as pl
from jax.experimental.pallas import tpu as pltpu

_IN, _HID, _OUT = 2, 10, 1          # logical PyTorch dims
_INP, _HIDP = 8, 16                 # sublane-padded dims used inside the kernel


def _mlp_kernel(xT_ref, w1_ref, b1_ref, w2_ref, b2_ref, w3_ref, b3_ref, o_ref):
    """One batch tile: xT (8, T) -> out (1, T). All contractions on the MXU, f32."""
    xT = xT_ref[...]                                                    # (8, T)

    # layer_1 + ReLU : (16, 8) @ (8, T) -> (16, T) on the MXU.
    h1 = jnp.dot(w1_ref[...], xT, preferred_element_type=jnp.float32)
    h1 = jnp.maximum(h1 + b1_ref[...], 0.0)                             # (16, T)

    # layer_2 + ReLU : (16, 16) @ (16, T) -> (16, T) on the MXU.
    h2 = jnp.dot(w2_ref[...], h1, preferred_element_type=jnp.float32)
    h2 = jnp.maximum(h2 + b2_ref[...], 0.0)                             # (16, T)

    # layer_3 (logits): (1, 16) @ (16, T) -> (1, T) on the MXU (no sublane reduce).
    out = jnp.dot(w3_ref[...], h2, preferred_element_type=jnp.float32) + b3_ref[...]
    o_ref[...] = out.astype(o_ref.dtype)                                # (1, T)


def _round_up(x, m):
    return ((x + m - 1) // m) * m


def circle_model_v0_forward(x, params, tile_n=65536):
    """x: (N, 2) float32. params: PyTorch-convention weights (out, in), biases (out,)."""
    assert tile_n % 128 == 0, "tile_n must be lane-aligned (multiple of 128)"
    n = x.shape[0]

    # Pad N only to a multiple of 128; the grid uses a partial last block for ragged
    # batches.  Padded columns compute garbage that never contaminates valid lanes
    # (all cross-element work contracts over sublanes) and are sliced off below.
    n_pad = _round_up(max(n, 1), 128)
    tile = min(tile_n, n_pad)
    # Keep >=2 grid steps once there is enough work to split (v7x megacore: one step
    # would leave the second TensorCore idle).
    if tile == n_pad and n_pad >= 2048:
        tile = _round_up((n_pad + 1) // 2, 128)
    grid_n = pl.cdiv(n_pad, tile)

    # Transposed, lane-dense input: batch on the lane axis, feature dim zero-padded
    # 2 -> 8 sublanes so the MXU contraction over the padding is exactly zero.
    xT = jnp.zeros((_INP, n_pad), jnp.float32).at[:_IN, :n].set(
        x.astype(jnp.float32).T)

    f32 = jnp.float32
    w1p = jnp.zeros((_HIDP, _INP), f32).at[:_HID, :_IN].set(params["w1"].astype(f32))
    b1p = jnp.zeros((_HIDP, 1), f32).at[:_HID, 0].set(params["b1"].astype(f32))
    w2p = jnp.zeros((_HIDP, _HIDP), f32).at[:_HID, :_HID].set(params["w2"].astype(f32))
    b2p = jnp.zeros((_HIDP, 1), f32).at[:_HID, 0].set(params["b2"].astype(f32))
    w3p = jnp.zeros((_OUT, _HIDP), f32).at[:, :_HID].set(
        params["w3"].reshape(_OUT, _HID).astype(f32))
    b3p = params["b3"].reshape(_OUT, 1).astype(f32)

    def resident(shape):   # weights/biases: same block every grid step (VMEM-resident)
        return pl.BlockSpec(shape, lambda i: (0, 0))

    out = pl.pallas_call(
        _mlp_kernel,
        out_shape=jax.ShapeDtypeStruct((_OUT, n_pad), jnp.float32),
        grid=(grid_n,),
        in_specs=[
            pl.BlockSpec((_INP, tile), lambda i: (0, i)),      # x^T batch tile
            resident((_HIDP, _INP)), resident((_HIDP, 1)),
            resident((_HIDP, _HIDP)), resident((_HIDP, 1)),
            resident((_OUT, _HIDP)), resident((_OUT, 1)),
        ],
        out_specs=pl.BlockSpec((_OUT, tile), lambda i: (0, i)),  # lane-dense output
        compiler_params=pltpu.CompilerParams(
            dimension_semantics=("parallel",),   # shard batch grid over both TCs (v7x)
            vmem_limit_bytes=32 * 1024 * 1024,   # safe on v5e/v6e/v7x
        ),
    )(xT, w1p, b1p, w2p, b2p, w3p, b3p)

    return out[0, :n].reshape(n, 1)


def init_params(key):
    """nn.Linear-style init: weight (out, in), bias (out,), U(-1/sqrt(fan_in), +)."""
    def linear(k, fan_in, fan_out):
        kw, kb = jax.random.split(k)
        bound = 1.0 / np.sqrt(fan_in)
        w = jax.random.uniform(kw, (fan_out, fan_in), jnp.float32, -bound, bound)
        b = jax.random.uniform(kb, (fan_out,), jnp.float32, -bound, bound)
        return w, b

    k1, k2, k3 = jax.random.split(key, 3)
    w1, b1 = linear(k1, _IN, _HID)
    w2, b2 = linear(k2, _HID, _HID)
    w3, b3 = linear(k3, _HID, _OUT)
    return {"w1": w1, "b1": b1, "w2": w2, "b2": b2, "w3": w3, "b3": b3}


def reference_forward_np(x, p):
    """Full-precision host reference (float64) of the PyTorch forward."""
    x = np.asarray(x, np.float64)
    w1, b1 = np.asarray(p["w1"], np.float64), np.asarray(p["b1"], np.float64)
    w2, b2 = np.asarray(p["w2"], np.float64), np.asarray(p["b2"], np.float64)
    w3, b3 = np.asarray(p["w3"], np.float64), np.asarray(p["b3"], np.float64)
    h1 = np.maximum(x @ w1.T + b1, 0.0)
    h2 = np.maximum(h1 @ w2.T + b2, 0.0)
    return h2 @ w3.T + b3


if __name__ == "__main__":
    key = jax.random.PRNGKey(0)
    k_x, k_x2, k_p = jax.random.split(key, 3)
    params = init_params(k_p)

    # Small batch (pads up to one 128-lane tile).
    batch = 8
    x = jax.random.normal(k_x, (batch, 2), dtype=jnp.float32)
    out = jax.block_until_ready(circle_model_v0_forward(x, params))
    assert out.shape == (batch, 1)
    np.testing.assert_allclose(np.asarray(out), reference_forward_np(x, params),
                               rtol=1e-5, atol=1e-5)

    # Ragged batch (not a multiple of 128) to exercise the padding / partial-block path.
    batch2 = 333
    x2 = jax.random.normal(k_x2, (batch2, 2), dtype=jnp.float32)
    out2 = jax.block_until_ready(circle_model_v0_forward(x2, params))
    assert out2.shape == (batch2, 1)
    np.testing.assert_allclose(np.asarray(out2), reference_forward_np(x2, params),
                               rtol=1e-5, atol=1e-5)

    # Multi-tile batch (exercises >=2 grid steps / megacore sharding path).
    batch3 = 4096
    x3 = jax.random.normal(k_x, (batch3, 2), dtype=jnp.float32)
    out3 = jax.block_until_ready(circle_model_v0_forward(x3, params, tile_n=2048))
    assert out3.shape == (batch3, 1)
    np.testing.assert_allclose(np.asarray(out3), reference_forward_np(x3, params),
                               rtol=1e-5, atol=1e-5)

    print("KERNEL_OK")
</pallas_src>

<mosaic_0001>
module attributes {stable_mosaic.version = 11 : i64} {
  func.func @_mlp_kernel(%arg0: i32, %arg1: memref<8x128xf32, #tpu.memory_space<vmem>>, %arg2: memref<16x8xf32, #tpu.memory_space<vmem>>, %arg3: memref<16x1xf32, #tpu.memory_space<vmem>>, %arg4: memref<16x16xf32, #tpu.memory_space<vmem>>, %arg5: memref<16x1xf32, #tpu.memory_space<vmem>>, %arg6: memref<1x16xf32, #tpu.memory_space<vmem>>, %arg7: memref<1x1xf32, #tpu.memory_space<vmem>>, %arg8: memref<1x128xf32, #tpu.memory_space<vmem>>) attributes {dimension_semantics = [#tpu.dimension_semantics<parallel>], iteration_bounds = array<i64: 1>, scalar_prefetch = 0 : i64, scratch_operands = 0 : i64, tpu.core_type = #tpu.core_type<tc>, window_params = [{transform_indices = @transform_0, window_bounds = array<i64: 8, 128>}, {pipeline_mode = #tpu.pipeline_mode<synchronous>, transform_indices = @transform_1, window_bounds = array<i64: 16, 8>}, {pipeline_mode = #tpu.pipeline_mode<synchronous>, transform_indices = @transform_2, window_bounds = array<i64: 16, 1>}, {pipeline_mode = #tpu.pipeline_mode<synchronous>, transform_indices = @transform_3, window_bounds = array<i64: 16, 16>}, {pipeline_mode = #tpu.pipeline_mode<synchronous>, transform_indices = @transform_4, window_bounds = array<i64: 16, 1>}, {pipeline_mode = #tpu.pipeline_mode<synchronous>, transform_indices = @transform_5, window_bounds = array<i64: 1, 16>}, {pipeline_mode = #tpu.pipeline_mode<synchronous>, transform_indices = @transform_6, window_bounds = array<i64: 1, 1>}, {transform_indices = @transform_7, window_bounds = array<i64: 1, 128>}]} {
    %c0 = arith.constant 0 : index
    %c0_0 = arith.constant 0 : index
    %0 = vector.load %arg1[%c0, %c0_0] : memref<8x128xf32, #tpu.memory_space<vmem>>, vector<8x128xf32>
    %c0_1 = arith.constant 0 : index
    %c0_2 = arith.constant 0 : index
    %1 = vector.load %arg2[%c0_1, %c0_2] : memref<16x8xf32, #tpu.memory_space<vmem>>, vector<16x8xf32>
    %cst = arith.constant dense<0.000000e+00> : vector<16x128xf32>
    %2 = tpu.matmul %1, %0, %cst {dimension_numbers = #tpu.dot_dimension_numbers<[1], [0], [0], [1], [0, 0, 1, 1], [], []>} : vector<16x8xf32>, vector<8x128xf32>, vector<16x128xf32> -> vector<16x128xf32>
    %c0_3 = arith.constant 0 : index
    %c0_4 = arith.constant 0 : index
    %3 = vector.load %arg3[%c0_3, %c0_4] : memref<16x1xf32, #tpu.memory_space<vmem>>, vector<16x1xf32>
    %4 = vector.broadcast %3 : vector<16x1xf32> to vector<16x128xf32>
    %5 = arith.addf %2, %4 : vector<16x128xf32>
    %cst_5 = arith.constant 0.000000e+00 : f32
    %6 = vector.broadcast %cst_5 : f32 to vector<16x128xf32>
    %7 = arith.maximumf %5, %6 : vector<16x128xf32>
    %c0_6 = arith.constant 0 : index
    %c0_7 = arith.constant 0 : index
    %8 = vector.load %arg4[%c0_6, %c0_7] : memref<16x16xf32, #tpu.memory_space<vmem>>, vector<16x16xf32>
    %cst_8 = arith.constant dense<0.000000e+00> : vector<16x128xf32>
    %9 = tpu.matmul %8, %7, %cst_8 {dimension_numbers = #tpu.dot_dimension_numbers<[1], [0], [0], [1], [0, 0, 1, 1], [], []>} : vector<16x16xf32>, vector<16x128xf32>, vector<16x128xf32> -> vector<16x128xf32>
    %c0_9 = arith.constant 0 : index
    %c0_10 = arith.constant 0 : index
    %10 = vector.load %arg5[%c0_9, %c0_10] : memref<16x1xf32, #tpu.memory_space<vmem>>, vector<16x1xf32>
    %11 = vector.broadcast %10 : vector<16x1xf32> to vector<16x128xf32>
    %12 = arith.addf %9, %11 : vector<16x128xf32>
    %cst_11 = arith.constant 0.000000e+00 : f32
    %13 = vector.broadcast %cst_11 : f32 to vector<16x128xf32>
    %14 = arith.maximumf %12, %13 : vector<16x128xf32>
    %c0_12 = arith.constant 0 : index
    %c0_13 = arith.constant 0 : index
    %15 = vector.load %arg6[%c0_12, %c0_13] : memref<1x16xf32, #tpu.memory_space<vmem>>, vector<1x16xf32>
    %cst_14 = arith.constant dense<0.000000e+00> : vector<1x128xf32>
    %16 = tpu.matmul %15, %14, %cst_14 {dimension_numbers = #tpu.dot_dimension_numbers<[1], [0], [0], [1], [0, 0, 1, 1], [], []>} : vector<1x16xf32>, vector<16x128xf32>, vector<1x128xf32> -> vector<1x128xf32>
    %c0_15 = arith.constant 0 : index
    %c0_16 = arith.constant 0 : index
    %17 = vector.load %arg7[%c0_15, %c0_16] : memref<1x1xf32, #tpu.memory_space<vmem>>, vector<1x1xf32>
    %18 = vector.broadcast %17 : vector<1x1xf32> to vector<1x128xf32>
    %19 = arith.addf %16, %18 : vector<1x128xf32>
    %c0_17 = arith.constant 0 : index
    %c0_18 = arith.constant 0 : index
    %20 = vector.load %arg8[%c0_17, %c0_18] : memref<1x128xf32, #tpu.memory_space<vmem>>, vector<1x128xf32>
    tpu.vector_store %arg8[%c0_17, %c0_18], %19 {strides = array<i32>} : memref<1x128xf32, #tpu.memory_space<vmem>>, vector<1x128xf32>,
    return
  }
  func.func @transform_0(%arg0: i32) -> (i32, i32) {
    %c0_i32 = arith.constant 0 : i32
    %c0_i32_0 = arith.constant 0 : i32
    return %c0_i32, %arg0 : i32, i32
  }
  func.func @transform_1(%arg0: i32) -> (i32, i32) {
    %c0_i32 = arith.constant 0 : i32
    %c0_i32_0 = arith.constant 0 : i32
    %c0_i32_1 = arith.constant 0 : i32
    return %c0_i32, %c0_i32_0 : i32, i32
  }
  func.func @transform_2(%arg0: i32) -> (i32, i32) {
    %c0_i32 = arith.constant 0 : i32
    %c0_i32_0 = arith.constant 0 : i32
    %c0_i32_1 = arith.constant 0 : i32
    return %c0_i32, %c0_i32_0 : i32, i32
  }
  func.func @transform_3(%arg0: i32) -> (i32, i32) {
    %c0_i32 = arith.constant 0 : i32
    %c0_i32_0 = arith.constant 0 : i32
    %c0_i32_1 = arith.constant 0 : i32
    return %c0_i32, %c0_i32_0 : i32, i32
  }
  func.func @transform_4(%arg0: i32) -> (i32, i32) {
    %c0_i32 = arith.constant 0 : i32
    %c0_i32_0 = arith.constant 0 : i32
    %c0_i32_1 = arith.constant 0 : i32
    return %c0_i32, %c0_i32_0 : i32, i32
  }
  func.func @transform_5(%arg0: i32) -> (i32, i32) {
    %c0_i32 = arith.constant 0 : i32
    %c0_i32_0 = arith.constant 0 : i32
    %c0_i32_1 = arith.constant 0 : i32
    return %c0_i32, %c0_i32_0 : i32, i32
  }
  func.func @transform_6(%arg0: i32) -> (i32, i32) {
    %c0_i32 = arith.constant 0 : i32
    %c0_i32_0 = arith.constant 0 : i32
    %c0_i32_1 = arith.constant 0 : i32
    return %c0_i32, %c0_i32_0 : i32, i32
  }
  func.func @transform_7(%arg0: i32) -> (i32, i32) {
    %c0_i32 = arith.constant 0 : i32
    %c0_i32_0 = arith.constant 0 : i32
    return %c0_i32, %arg0 : i32, i32
  }
}

</mosaic_0001>

<bundles_post_ra>
// kernel: tpu_custom_call.1
= control target key start
LH: loop header
LB: loop body
LE: loop exit
PB: predicated region body
PF: predicated region fallthrough
CT: control target
= control target key end

     0   :  { %s289_s0 = inlined_call_operand.vmem [shape: f32[8,128], index: 0, kind: input, shape index: {}]   ;;  %s290_s1 = inlined_call_operand.vmem [shape: f32[16,8], index: 1, kind: input, shape index: {}]   ;;  %s291_s2 = inlined_call_operand.vmem [shape: f32[16,1], index: 2, kind: input, shape index: {}]   ;;  %s292_s3 = inlined_call_operand.vmem [shape: f32[16,16], index: 3, kind: input, shape index: {}]   ;;  %s293_s4 = inlined_call_operand.vmem [shape: f32[16,1], index: 4, kind: input, shape index: {}]   ;;  %s294_s5 = inlined_call_operand.vmem [shape: f32[1,16], index: 5, kind: input, shape index: {}]   ;;  %s295_s6 = inlined_call_operand.<no memory space> [shape: f32[1,1], index: 6, kind: input, shape index: {}]   ;;  %s296_s7 = inlined_call_operand.hbm [shape: f32[1,128], index: 7, kind: output, shape index: {}]  }
   0x1   :  { %v12_v0 = vstv %s295_s6 }
   0x2   :  { %13 = vst [vmem:[#allocation2] sm:$0x1] %v12_v0 }
   0x3   :  { %v29_v1 = vld [vmem:[%s289_s0] sm:$0xff]  ;;  %vm44_vm0 = vcmask 64512   ;;  %v33_v3 = vld [vmem:[%s291_s2 + $0x8] sm:$0xff]  ;;  %v208_v4 = vmov 0  }
   0x4   :  { %v30_v2 = vld [vmem:[%s290_s1] sm:$0xff]  ;;  %66 = vmatpush.msra.mxu0 %v29_v1  ;;  %179 = vset.pattern.permute.xlu0 %v208_v4 }
   0x5   :  { %14 = vsyncpa [#allocation4], 0  ;;  %170 = vmatmul.msk.f32.vlgmr.msra.gmra.mxu0 %vm44_vm0, %v30_v2  ;;  %41 = vperm.xlu0 %179, %v33_v3   ;;  %v31_v5 = vld [vmem:[%s290_s1 + $0x8] sm:$0xff]  ;;  %v32_v6 = vld [vmem:[%s291_s2] sm:$0xff]  ;;  %vm90_vm1 = vcmask 130048   ;;  %s161_s21 = sshll.u32 %s296_s7, 4  ;;  %s162_s21 = int_to_ptr.hbm [resolvable:$true] %s161_s21 }
   0x6   :  { %180 = vset.pattern.permute.xlu1 %v208_v4  ;;  %181 = vset.pattern.permute.xlu2 %v208_v4  ;;  %v79_v7 = vld [vmem:[%s293_s4 + $0x8] sm:$0xff]  ;;  %v78_v8 = vld [vmem:[%s293_s4] sm:$0xff] }
   0x7   :  { %87 = vperm.xlu1 %180, %v79_v7   ;;  %v76_v17 = vld [vmem:[%s292_s3] sm:$0xff]  ;;  %v77_v18 = vld [vmem:[%s292_s3 + $0x8] sm:$0xff]  ;;  %s209_s3 = smov [#allocation3]  }
   0x8   :  { %v122_v28 = vld [vmem:[%s294_s5] sm:$0x1]  ;;  %s159_s18 = sshll.u32 %s209_s3, 4  ;;  %s160_s18 = int_to_ptr.vmem [resolvable:$true] %s159_s18 }
   0x9   :  { %v123_v19 = vld [vmem:[#allocation2] sm:$0x1] }
   0xa   :  { %126 = vperm.xlu2 %181, %v123_v19  }
   0xd   :  { %171 = vmatmul.msk.f32.gmra.mxu0 %vm44_vm0, %v31_v5  ;;  %36 = vperm.xlu0 %179, %v32_v6  }
   0xf   :  { %82 = vperm.xlu1 %180, %v78_v8  }
  0x64   :  { %v127_v29 = vpop.permute.xlu2 %126 }
  0x65   :  { %v129_v30 = vperm.slane %v127_v29, 0 }
  0x77   :  { %v42_v9 = vpop.permute.xlu0 %41 }
  0x79   :  { %v88_v20 = vpop.permute.xlu1 %87 }
  0x7f   :  { %v37_v11 = vpop.permute.xlu0 %36 }
  0x81   :  { %v83_v21 = vpop.permute.xlu1 %82 }
  0x82   :  { %v68_v10 = vpop.f32.mrf.mxu0 }
  0x83   :  { %v69_v13 = vadd.f32 %v68_v10, %v37_v11 }
  0x85   :  { %v74_v16 = vmax.f32 %v69_v13, 0.0 }
  0x8a   :  { %v71_v12 = vpop.f32.mrf.mxu0 }
  0x8b   :  { %v72_v14 = vadd.f32 %v71_v12, %v42_v9 }
  0x8d   :  { %v75_v15 = vmax.f32 %v72_v14, 0.0 }
  0x8f   :  { %111 = vmatpush.msra.mxu1 %v75_v15  ;;  %175 = vmatpush.msra.mxu3 %v75_v15 }
  0x91   :  { %112 = vmatpush.msra.mxu1 %v74_v16  ;;  %176 = vmatpush.msra.mxu3 %v74_v16 }
  0x92   :  { %172 = vmatmul.msk.f32.vlgmr.msra.gmra.mxu1 %vm90_vm1, %v76_v17  ;;  %173 = vmatmul.msk.f32.vlgmr.msra.gmra.mxu3 %vm90_vm1, %v77_v18 }
 0x10f   :  { %v114_v22 = vpop.f32.mrf.mxu1 }
 0x110   :  { %v115_v24 = vadd.f32 %v114_v22, %v83_v21 }
 0x112   :  { %v120_v27 = vmax.f32 %v115_v24, 0.0 }
 0x115   :  { %v117_v23 = vpop.f32.mrf.mxu3 }
 0x116   :  { %v118_v25 = vadd.f32 %v117_v23, %v88_v20 }
 0x118   :  { %v121_v26 = vmax.f32 %v118_v25, 0.0 }
 0x11a   :  { %147 = vmatpush.msra.mxu2 %v121_v26 }
 0x11c   :  { %148 = vmatpush.msra.mxu2 %v120_v27 }
 0x11d   :  { %174 = vmatmul.msk.f32.vlgmr.msra.gmra.mxu2 %vm90_vm1, %v122_v28 }
 0x1a0   :  { %v150_v31 = vpop.f32.mrf.mxu2 }
 0x1a1   :  { %v151_v32 = vadd.f32 %v150_v31, %v129_v30 }
 0x1a3   :  { %153 = vst [vmem:[#allocation3] sm:$0x1] %v151_v32 }
 0x1a4   :  { %164 = dma.vmem_to_hbm [thread:$0]  %s160_s18, 16, %s162_s21, [#allocation4]  }
 0x1a5   :  { %206 = dma.done.wait [#allocation4], 16  }
 0x1a6   :  { %207 = vsyncadd [#allocation4], 4294967280 }
 0x1a7   :  { %169 = vsyncpa [#allocation4], 1 }

</bundles_post_ra>
